<compile_context>
chip_gen: v7x
topology: tpu7x:2x2x1
jax: 0.10.0
libtpu: 0.0.40
codegen_flags: <defaults>
</compile_context>

<pallas_src>
import functools
import math

import jax
import jax.numpy as jnp
from jax.experimental import pallas as pl
from jax.experimental.pallas import tpu as pltpu

VMEM_LIMIT = 40 * 1024 * 1024  # per-call scoped-VMEM budget; leaves >=24 MiB headroom on v7x


def _pick_tile(dim, target):
    """Largest tile <= target that divides dim and keeps (8,128) alignment, else full dim."""
    if dim <= target:
        return dim
    for t in range(target, 127, -128):
        if dim % t == 0:
            return t
    return dim


# --------------------------- weight-resident dense (+ fused epilogues) ---------------------------

def _dense_kernel(x_ref, w_ref, b_ref, o_ref, *, activation):
    y = jnp.dot(x_ref[...], w_ref[...], preferred_element_type=jnp.float32) + b_ref[...]
    if activation == "gelu":
        # TODO(synk): HF BERT default is exact (erf) GELU; tanh-approx used for robust lowering.
        y = jax.nn.gelu(y, approximate=True)
    o_ref[...] = y.astype(o_ref.dtype)


def dense(x, w, b, activation=None, out_dtype=jnp.bfloat16, tm=512):
    """y = act(x @ w + b). N/K untiled (weight resident), tm=512 M-tiles."""
    M, K = x.shape
    N = w.shape[1]
    tm = _pick_tile(M, tm)
    return pl.pallas_call(
        functools.partial(_dense_kernel, activation=activation),
        out_shape=jax.ShapeDtypeStruct((M, N), out_dtype),
        grid=(M // tm,),
        in_specs=[pl.BlockSpec((tm, K), lambda i: (i, 0)),
                  pl.BlockSpec((K, N), lambda i: (0, 0)),     # constant block: DMA'd once
                  pl.BlockSpec((1, N), lambda i: (0, 0))],
        out_specs=pl.BlockSpec((tm, N), lambda i: (i, 0)),
        compiler_params=pltpu.CompilerParams(
            dimension_semantics=("parallel",),
            vmem_limit_bytes=VMEM_LIMIT),
    )(x, w, b)


def _dense_ln_kernel(x_ref, w_ref, b_ref, r_ref, g_ref, be_ref, o_ref):
    y = (jnp.dot(x_ref[...], w_ref[...], preferred_element_type=jnp.float32)
         + b_ref[...] + r_ref[...].astype(jnp.float32))
    mean = jnp.mean(y, axis=-1, keepdims=True)
    c = y - mean
    var = jnp.mean(c * c, axis=-1, keepdims=True)
    o_ref[...] = (c * jax.lax.rsqrt(var + 1e-12) * g_ref[...] + be_ref[...]).astype(o_ref.dtype)


def dense_ln(x, w, b, residual, gamma, beta, out_dtype=jnp.bfloat16, tm=512):
    """y = LayerNorm(x @ w + b + residual), weight resident, fused bias/residual/LN epilogue."""
    M, K = x.shape
    N = w.shape[1]
    tm = _pick_tile(M, tm)
    return pl.pallas_call(
        _dense_ln_kernel,
        out_shape=jax.ShapeDtypeStruct((M, N), out_dtype),
        grid=(M // tm,),
        in_specs=[pl.BlockSpec((tm, K), lambda i: (i, 0)),
                  pl.BlockSpec((K, N), lambda i: (0, 0)),
                  pl.BlockSpec((1, N), lambda i: (0, 0)),
                  pl.BlockSpec((tm, N), lambda i: (i, 0)),
                  pl.BlockSpec((1, N), lambda i: (0, 0)),
                  pl.BlockSpec((1, N), lambda i: (0, 0))],
        out_specs=pl.BlockSpec((tm, N), lambda i: (i, 0)),
        compiler_params=pltpu.CompilerParams(
            dimension_semantics=("parallel",),
            vmem_limit_bytes=VMEM_LIMIT),
    )(x, w, b, residual, gamma, beta)


# ---------------- attention-output projection + residual + LN (head-reduction fused) ----------------

def _attn_out_ln_kernel(ctx_ref, wo_ref, b_ref, r_ref, g_ref, be_ref, o_ref, acc_ref):
    h = pl.program_id(2)

    @pl.when(h == 0)
    def _():
        acc_ref[...] = jnp.zeros_like(acc_ref)

    # reduce over heads directly from the (B, NH, S, DH) attention output — no ctx transpose
    acc_ref[...] += jnp.dot(ctx_ref[0, 0], wo_ref[0], preferred_element_type=jnp.float32)

    @pl.when(h == pl.num_programs(2) - 1)
    def _():
        y = acc_ref[...] + b_ref[...] + r_ref[0].astype(jnp.float32)
        mean = jnp.mean(y, axis=-1, keepdims=True)
        c = y - mean
        var = jnp.mean(c * c, axis=-1, keepdims=True)
        o_ref[0] = (c * jax.lax.rsqrt(var + 1e-12) * g_ref[...] + be_ref[...]).astype(o_ref.dtype)


def attn_out_dense_ln(ctx, wo3, b, residual, gamma, beta, out_dtype=jnp.bfloat16, ts=512):
    """out = LayerNorm(sum_h ctx[:,h] @ wo3[h] + b + residual); ctx (B,NH,S,DH), wo3 (NH,DH,H)."""
    B, NH, S, DH = ctx.shape
    H = wo3.shape[2]
    ts = _pick_tile(S, ts)
    return pl.pallas_call(
        _attn_out_ln_kernel,
        out_shape=jax.ShapeDtypeStruct((B, S, H), out_dtype),
        grid=(B, S // ts, NH),
        in_specs=[pl.BlockSpec((1, 1, ts, DH), lambda bb, i, h: (bb, h, i, 0)),
                  pl.BlockSpec((1, DH, H), lambda bb, i, h: (h, 0, 0)),
                  pl.BlockSpec((1, H), lambda bb, i, h: (0, 0)),
                  pl.BlockSpec((1, ts, H), lambda bb, i, h: (bb, i, 0)),
                  pl.BlockSpec((1, H), lambda bb, i, h: (0, 0)),
                  pl.BlockSpec((1, H), lambda bb, i, h: (0, 0))],
        out_specs=pl.BlockSpec((1, ts, H), lambda bb, i, h: (bb, i, 0)),
        scratch_shapes=[pltpu.VMEM((ts, H), jnp.float32)],
        compiler_params=pltpu.CompilerParams(
            dimension_semantics=("parallel", "parallel", "arbitrary"),
            vmem_limit_bytes=VMEM_LIMIT),
    )(ctx, wo3, b, residual, gamma, beta)


# ------------------------------- embedding LayerNorm -------------------------------

def _layernorm_kernel(x_ref, g_ref, b_ref, o_ref):
    x = x_ref[...].astype(jnp.float32)
    mean = jnp.mean(x, axis=-1, keepdims=True)
    c = x - mean
    var = jnp.mean(c * c, axis=-1, keepdims=True)
    o_ref[...] = (c * jax.lax.rsqrt(var + 1e-12) * g_ref[...] + b_ref[...]).astype(o_ref.dtype)


def layernorm(x, g, b, out_dtype=jnp.bfloat16, tm=512):
    M, H = x.shape
    tm = _pick_tile(M, tm)
    return pl.pallas_call(
        _layernorm_kernel,
        out_shape=jax.ShapeDtypeStruct((M, H), out_dtype),
        grid=(M // tm,),
        in_specs=[pl.BlockSpec((tm, H), lambda i: (i, 0)),
                  pl.BlockSpec((1, H), lambda i: (0, 0)),
                  pl.BlockSpec((1, H), lambda i: (0, 0))],
        out_specs=pl.BlockSpec((tm, H), lambda i: (i, 0)),
        compiler_params=pltpu.CompilerParams(dimension_semantics=("parallel",),
                                             vmem_limit_bytes=VMEM_LIMIT),
    )(x, g, b)


# ------------------------------- flash-style attention -------------------------------

def _flash_attn_kernel(q_ref, kt_ref, v_ref, bias_ref, o_ref, m_sc, l_sc, acc_sc, *, scale):
    ki = pl.program_id(3)

    @pl.when(ki == 0)
    def _():
        m_sc[...] = jnp.full(m_sc.shape, -1e30, jnp.float32)
        l_sc[...] = jnp.zeros(l_sc.shape, jnp.float32)
        acc_sc[...] = jnp.zeros(acc_sc.shape, jnp.float32)

    q = q_ref[0, 0] * scale              # (tq, DH) bf16; scale folded into q (DH << tkv mults)
    kt = kt_ref[0, 0]                    # (DH, tkv) bf16, pre-transposed K -> MXU-native dot
    v = v_ref[0, 0]                      # (tkv, DH)
    s = jnp.dot(q, kt, preferred_element_type=jnp.float32) + bias_ref[0]   # (tq, tkv)

    m_prev = m_sc[...]
    m_new = jnp.maximum(m_prev, jnp.max(s, axis=-1, keepdims=True))
    alpha = jnp.exp(m_prev - m_new)
    p = jnp.exp(s - m_new)
    l_sc[...] = alpha * l_sc[...] + jnp.sum(p, axis=-1, keepdims=True)
    acc_sc[...] = alpha * acc_sc[...] + jnp.dot(p.astype(v.dtype), v,
                                                preferred_element_type=jnp.float32)
    m_sc[...] = m_new

    @pl.when(ki == pl.num_programs(3) - 1)
    def _():
        o_ref[0, 0] = (acc_sc[...] / l_sc[...]).astype(o_ref.dtype)


def flash_attention(q, kt, v, bias, scale, tq=512, tkv=512):
    """q/v: (B, NH, S, DH); kt: (B, NH, DH, S) pre-transposed; bias: (B, 1, S) additive."""
    B, NH, S, DH = q.shape
    tq, tkv = _pick_tile(S, tq), _pick_tile(S, tkv)
    q_spec = pl.BlockSpec((1, 1, tq, DH), lambda b, h, qi, ki: (b, h, qi, 0))
    kt_spec = pl.BlockSpec((1, 1, DH, tkv), lambda b, h, qi, ki: (b, h, 0, ki))
    v_spec = pl.BlockSpec((1, 1, tkv, DH), lambda b, h, qi, ki: (b, h, ki, 0))
    b_spec = pl.BlockSpec((1, 1, tkv), lambda b, h, qi, ki: (b, 0, ki))
    return pl.pallas_call(
        functools.partial(_flash_attn_kernel, scale=scale),
        out_shape=jax.ShapeDtypeStruct((B, NH, S, DH), q.dtype),
        grid=(B, NH, S // tq, S // tkv),
        in_specs=[q_spec, kt_spec, v_spec, b_spec],
        out_specs=q_spec,
        scratch_shapes=[pltpu.VMEM((tq, 1), jnp.float32),
                        pltpu.VMEM((tq, 1), jnp.float32),
                        pltpu.VMEM((tq, DH), jnp.float32)],
        compiler_params=pltpu.CompilerParams(
            dimension_semantics=("parallel", "parallel", "parallel", "arbitrary"),
            vmem_limit_bytes=VMEM_LIMIT),
    )(q, kt, v, bias)


# ------------------------ CRF (forward score + in-kernel Viterbi) ------------------------

def _crf_kernel(em_ref, tags_ref, mask_ref, start_ref, end_ref, trans_ref,
                llh_ref, tagout_ref, len_ref, hist_sc):
    # em: (T, K, Bb) f32   tags: (T, 1, Bb) i32   mask: (T, 1, Bb) f32
    # start/end: (K, 1)    trans: (K, K)
    # outputs: llh (1, Bb) f32, tagout (T, 1, Bb) i32, lengths (1, Bb) i32
    # scratch:  hist (T, K, Bb) i32 backpointers (never leaves VMEM)
    T, K, B = em_ref.shape

    # hoisted loop-invariant iotas / broadcasts
    iota_kb = jax.lax.broadcasted_iota(jnp.int32, (K, B), 0)
    prev_iota = jax.lax.broadcasted_iota(jnp.int32, (K, K, B), 0)
    start = start_ref[...]                     # (K, 1)
    end = end_ref[...]                         # (K, 1)
    trans3 = trans_ref[...][:, :, None]        # (Kprev, Kcur, 1)

    em0 = em_ref[0]                                       # (K, B)
    oh0 = (iota_kb == tags_ref[0]).astype(jnp.float32)    # one-hot of tags[0] over sublanes
    num0 = jnp.sum((start + em0) * oh0, axis=0, keepdims=True)   # (1, B) gold path score
    den0 = start + em0                                           # forward (alpha) scores
    vit0 = start + em0                                           # viterbi scores
    hist_sc[0] = jnp.zeros((K, B), jnp.int32)

    def body(t, carry):
        num, den, vit, prev_oh, last_oh = carry
        em_t = em_ref[t]                                  # (K, B)
        m_t = mask_ref[t]                                 # (1, B)
        oh_t = (iota_kb == tags_ref[t]).astype(jnp.float32)

        # gold path: transitions[tags[t-1], tags[t]] — single fused product + joint reduction
        tr = jnp.sum(prev_oh[:, None, :] * oh_t[None, :, :] * trans3, axis=(0, 1))[None, :]
        em_sc = jnp.sum(em_t * oh_t, axis=0, keepdims=True)
        num = num + (tr + em_sc) * m_t

        # partition function: logsumexp over previous tag (axis 0)
        mat = den[:, None, :] + trans3 + em_t[None, :, :]               # (Kp, Kc, B)
        mmax = jnp.max(mat, axis=0, keepdims=True)
        nden = mmax[0] + jnp.log(jnp.sum(jnp.exp(mat - mmax), axis=0))
        den = jnp.where(m_t > 0, nden, den)

        # Viterbi: max + first-argmax over previous tag, backpointers into VMEM scratch
        vmat = vit[:, None, :] + trans3 + em_t[None, :, :]
        vmax = jnp.max(vmat, axis=0, keepdims=True)
        idx = jnp.min(jnp.where(vmat >= vmax, prev_iota, K), axis=0).astype(jnp.int32)
        hist_sc[t] = idx
        vit = jnp.where(m_t > 0, vmax[0], vit)

        last_oh = jnp.where(m_t > 0, oh_t, last_oh)
        return num, den, vit, oh_t, last_oh

    num, den, vit, _, last_oh = jax.lax.fori_loop(1, T, body, (num0, den0, vit0, oh0, oh0),
                                                  unroll=2)

    num = num + jnp.sum(end * last_oh, axis=0, keepdims=True)
    den = den + end
    dmax = jnp.max(den, axis=0, keepdims=True)
    log_z = dmax + jnp.log(jnp.sum(jnp.exp(den - dmax), axis=0, keepdims=True))
    llh_ref[...] = num - log_z

    # Viterbi finalize + in-kernel backtrace (serial over T, batch on lanes)
    fin = vit + end                                                      # (K, B)
    fmax = jnp.max(fin, axis=0, keepdims=True)
    best_last = jnp.min(jnp.where(fin >= fmax, iota_kb, K), axis=0,
                        keepdims=True).astype(jnp.int32)                 # (1, B)
    seq_ends = jnp.sum(mask_ref[...], axis=0).astype(jnp.int32) - 1      # (1, B)
    len_ref[...] = seq_ends + 1

    def bt_body(i, cur):
        t = T - 1 - i
        hist_next = hist_sc[jnp.minimum(t + 1, T - 1)]                   # (K, B)
        from_hist = jnp.sum(jnp.where(iota_kb == cur, hist_next, 0),
                            axis=0, keepdims=True)                       # (1, B)
        cur = jnp.where(t == seq_ends, best_last,
                        jnp.where(t < seq_ends, from_hist, cur))
        tagout_ref[t] = cur
        return cur

    jax.lax.fori_loop(0, T, bt_body, best_last, unroll=2)


def crf_forward_decode(emissions, tags, mask, crf_params):
    B, T, K = emissions.shape
    em_t = jnp.transpose(emissions, (1, 2, 0)).astype(jnp.float32)          # (T, K, B)
    tags_t = jnp.transpose(tags.astype(jnp.int32), (1, 0))[:, None, :]      # (T, 1, B)
    mask_t = jnp.transpose(mask.astype(jnp.float32), (1, 0))[:, None, :]    # (T, 1, B)
    # batch-lane grid: emissions stream per tile, both v7x TCs get independent blocks
    Bb = 128 if (B > 128 and B % 128 == 0) else B
    llh, tagout, lengths = pl.pallas_call(
        _crf_kernel,
        out_shape=(jax.ShapeDtypeStruct((1, B), jnp.float32),
                   jax.ShapeDtypeStruct((T, 1, B), jnp.int32),
                   jax.ShapeDtypeStruct((1, B), jnp.int32)),
        grid=(B // Bb,),
        in_specs=[pl.BlockSpec((T, K, Bb), lambda i: (0, 0, i)),
                  pl.BlockSpec((T, 1, Bb), lambda i: (0, 0, i)),
                  pl.BlockSpec((T, 1, Bb), lambda i: (0, 0, i)),
                  pl.BlockSpec((K, 1), lambda i: (0, 0)),
                  pl.BlockSpec((K, 1), lambda i: (0, 0)),
                  pl.BlockSpec((K, K), lambda i: (0, 0))],
        out_specs=(pl.BlockSpec((1, Bb), lambda i: (0, i)),
                   pl.BlockSpec((T, 1, Bb), lambda i: (0, 0, i)),
                   pl.BlockSpec((1, Bb), lambda i: (0, i))),
        scratch_shapes=[pltpu.VMEM((T, K, Bb), jnp.int32)],
        compiler_params=pltpu.CompilerParams(
            dimension_semantics=("parallel",),
            vmem_limit_bytes=VMEM_LIMIT),
    )(em_t, tags_t, mask_t,
      crf_params["start"].reshape(K, 1),
      crf_params["end"].reshape(K, 1),
      crf_params["trans"])
    return llh[0], jnp.transpose(tagout[:, 0, :]), lengths[0]   # (B,), (B, T), (B,)


# ---------------------------------- model glue ----------------------------------

def encoder_layer(x, p, bias, B, S):
    H = x.shape[1]
    NH = p["num_heads"]
    DH = H // NH
    qkv = dense(x, p["wqkv"], p["bqkv"])                             # fused QKV (B*S, 3H) bf16
    qkv = qkv.reshape(B, S, 3, NH, DH)
    q = qkv[:, :, 0].transpose(0, 2, 1, 3)                           # (B, NH, S, DH)
    kt = qkv[:, :, 1].transpose(0, 2, 3, 1)                          # (B, NH, DH, S) K pre-transposed
    v = qkv[:, :, 2].transpose(0, 2, 1, 3)                           # (B, NH, S, DH)
    ctx = flash_attention(q, kt, v, bias, scale=1.0 / math.sqrt(DH))  # (B, NH, S, DH) bf16
    # attn-out projection reduces over heads inside the kernel -> no ctx transpose round trip
    x3 = attn_out_dense_ln(ctx, p["wo"], p["bo"], x.reshape(B, S, H), p["ln1_g"], p["ln1_b"])
    x = x3.reshape(B * S, H)
    ff = dense(x, p["w1"], p["b1"], activation="gelu")
    x = dense_ln(ff, p["w2"], p["b2"], x, p["ln2_g"], p["ln2_b"])    # FFN out + residual + LN
    return x


def bert_emissions(params, input_ids, attention_mask, token_type_ids):
    B, S = input_ids.shape
    H = params["word_emb"].shape[1]
    pos_ids = jnp.arange(S, dtype=jnp.int32)[None, :]
    x = (jnp.take(params["word_emb"], input_ids, axis=0)
         + jnp.take(params["pos_emb"], pos_ids, axis=0)
         + jnp.take(params["type_emb"], token_type_ids, axis=0))
    # bf16 LN input halves the LN kernel's HBM read (f32 math stays inside the kernel)
    x = x.reshape(B * S, H).astype(jnp.bfloat16)
    x = layernorm(x, params["emb_ln_g"], params["emb_ln_b"])                 # bf16 activations
    bias = ((1.0 - attention_mask.astype(jnp.float32)) * -10000.0)[:, None, :]   # (B, 1, S)
    for lp in params["layers"]:
        x = encoder_layer(x, lp, bias, B, S)
    # classifier head: padded to a lane-dense 128-wide output, sliced back outside the kernel
    logits = dense(x, params["cls_w"], params["cls_b"], out_dtype=jnp.float32)
    logits = logits[:, : params["num_tags"]]
    return logits.reshape(B, S, params["num_tags"])


def bert_crf_forward(params, input_ids, tags, attention_mask, token_type_ids,
                     decode=True, reduction="mean"):
    emissions = bert_emissions(params, input_ids, attention_mask, token_type_ids)
    new_emissions = emissions[:, 1:-1]                   # drop [CLS]/[SEP] positions
    new_mask = attention_mask[:, 2:].astype(bool)
    new_tags = tags[:, 1:-1]

    llh, tag_mat, lengths = crf_forward_decode(new_emissions, new_tags, new_mask, params["crf"])
    # torchcrf CRF.forward returns the log-likelihood; the module returns it directly as "loss".
    if reduction == "sum":
        loss = jnp.sum(llh)
    elif reduction == "none":
        loss = llh
    else:
        loss = jnp.mean(llh)

    if decode:
        tag_np = jax.device_get(tag_mat)
        len_np = jax.device_get(lengths)
        tag_list = [tag_np[b, : int(len_np[b])].tolist() for b in range(tag_np.shape[0])]
        return [loss, tag_list]
    return [loss]


# ------------------------------- parameters -------------------------------

def init_params(key, vocab, max_pos, hidden, n_heads, intermediate, n_tags, n_layers,
                type_vocab=2):
    def nrm(k, shape):
        return 0.02 * jax.random.normal(k, shape, jnp.float32)

    def bf(x):
        return x.astype(jnp.bfloat16)

    keys = iter(jax.random.split(key, 128))
    nt_pad = ((n_tags + 127) // 128) * 128
    cls_w = jnp.zeros((hidden, nt_pad), jnp.float32).at[:, :n_tags].set(
        nrm(next(keys), (hidden, n_tags)))
    dh = hidden // n_heads

    params = {
        "num_tags": n_tags,
        "word_emb": nrm(next(keys), (vocab, hidden)),
        "pos_emb": nrm(next(keys), (max_pos, hidden)),
        "type_emb": nrm(next(keys), (type_vocab, hidden)),
        "emb_ln_g": jnp.ones((1, hidden), jnp.float32),
        "emb_ln_b": jnp.zeros((1, hidden), jnp.float32),
        "cls_w": bf(cls_w),
        "cls_b": jnp.zeros((1, nt_pad), jnp.float32),
        "layers": [],
    }
    for _ in range(n_layers):
        wq = nrm(next(keys), (hidden, hidden))
        wk = nrm(next(keys), (hidden, hidden))
        wv = nrm(next(keys), (hidden, hidden))
        wo = nrm(next(keys), (hidden, hidden))
        params["layers"].append({
            "num_heads": n_heads,
            "wqkv": bf(jnp.concatenate([wq, wk, wv], axis=1)),          # fused QKV weight
            "bqkv": jnp.zeros((1, 3 * hidden), jnp.float32),
            "wo": bf(wo.reshape(n_heads, dh, hidden)),                  # (NH, DH, H) for head-fused proj
            "bo": jnp.zeros((1, hidden), jnp.float32),
            "ln1_g": jnp.ones((1, hidden), jnp.float32),
            "ln1_b": jnp.zeros((1, hidden), jnp.float32),
            "w1": bf(nrm(next(keys), (hidden, intermediate))),
            "b1": jnp.zeros((1, intermediate), jnp.float32),
            "w2": bf(nrm(next(keys), (intermediate, hidden))),
            "b2": jnp.zeros((1, hidden), jnp.float32),
            "ln2_g": jnp.ones((1, hidden), jnp.float32),
            "ln2_b": jnp.zeros((1, hidden), jnp.float32),
        })
    # torchcrf initializes uniform(-0.1, 0.1)
    params["crf"] = {
        "start": jax.random.uniform(next(keys), (n_tags,), jnp.float32, -0.1, 0.1),
        "end": jax.random.uniform(next(keys), (n_tags,), jnp.float32, -0.1, 0.1),
        "trans": jax.random.uniform(next(keys), (n_tags, n_tags), jnp.float32, -0.1, 0.1),
    }
    return params


# ---------------------------------- main ----------------------------------

if __name__ == "__main__":
    B, S = 2, 8              # batch, sequence length (incl. [CLS]/[SEP])
    HIDDEN, N_HEADS = 32, 2
    INTERMEDIATE = 64
    VOCAB = 50
    NUM_TAGS = 2
    N_LAYERS = 2

    key = jax.random.PRNGKey(0)
    k_params, k_ids, k_tags = jax.random.split(key, 3)

    params = init_params(k_params, VOCAB, S, HIDDEN, N_HEADS, INTERMEDIATE, NUM_TAGS, N_LAYERS)

    input_ids = jax.random.randint(k_ids, (B, S), 0, VOCAB, dtype=jnp.int32)
    token_type_ids = jnp.zeros((B, S), jnp.int32)
    attention_mask = jnp.ones((B, S), jnp.int32)
    tags = jax.random.randint(k_tags, (B, S), 0, NUM_TAGS, dtype=jnp.int32)

    loss, tag_list = bert_crf_forward(params, input_ids, tags, attention_mask, token_type_ids,
                                      decode=True, reduction="mean")
    jax.block_until_ready(loss)
    assert len(tag_list) == B and all(len(t) == S - 2 for t in tag_list)
    print("KERNEL_OK")
</pallas_src>

<mosaic_0001>
module attributes {stable_mosaic.version = 11 : i64} {
  func.func @_layernorm_kernel(%arg0: i32, %arg1: memref<16x32xbf16, #tpu.memory_space<vmem>>, %arg2: memref<1x32xf32, #tpu.memory_space<vmem>>, %arg3: memref<1x32xf32, #tpu.memory_space<vmem>>, %arg4: memref<16x32xbf16, #tpu.memory_space<vmem>>) attributes {dimension_semantics = [#tpu.dimension_semantics<parallel>], iteration_bounds = array<i64: 1>, scalar_prefetch = 0 : i64, scratch_operands = 0 : i64, tpu.core_type = #tpu.core_type<tc>, window_params = [{transform_indices = @transform_0, window_bounds = array<i64: 16, 32>}, {pipeline_mode = #tpu.pipeline_mode<synchronous>, transform_indices = @transform_1, window_bounds = array<i64: 1, 32>}, {pipeline_mode = #tpu.pipeline_mode<synchronous>, transform_indices = @transform_2, window_bounds = array<i64: 1, 32>}, {transform_indices = @transform_3, window_bounds = array<i64: 16, 32>}]} {
    %c0 = arith.constant 0 : index
    %c0_0 = arith.constant 0 : index
    %0 = vector.load %arg1[%c0, %c0_0] : memref<16x32xbf16, #tpu.memory_space<vmem>>, vector<16x32xbf16>
    %1 = arith.extf %0 : vector<16x32xbf16> to vector<16x32xf32>
    %cst = arith.constant dense<0.000000e+00> : vector<16xf32>
    %2 = vector.multi_reduction <add>, %1, %cst [1] : vector<16x32xf32> to vector<16xf32>
    %3 = vector.shape_cast %2 : vector<16xf32> to vector<16x1xf32>
    %cst_1 = arith.constant 3.200000e+01 : f32
    %4 = vector.broadcast %cst_1 : f32 to vector<16x1xf32>
    %5 = arith.divf %3, %4 : vector<16x1xf32>
    %6 = vector.broadcast %5 : vector<16x1xf32> to vector<16x32xf32>
    %7 = arith.subf %1, %6 : vector<16x32xf32>
    %8 = arith.mulf %7, %7 : vector<16x32xf32>
    %cst_2 = arith.constant dense<0.000000e+00> : vector<16xf32>
    %9 = vector.multi_reduction <add>, %8, %cst_2 [1] : vector<16x32xf32> to vector<16xf32>
    %10 = vector.shape_cast %9 : vector<16xf32> to vector<16x1xf32>
    %cst_3 = arith.constant 3.200000e+01 : f32
    %11 = vector.broadcast %cst_3 : f32 to vector<16x1xf32>
    %12 = arith.divf %10, %11 : vector<16x1xf32>
    %cst_4 = arith.constant 9.99999996E-13 : f32
    %13 = vector.broadcast %cst_4 : f32 to vector<16x1xf32>
    %14 = arith.addf %12, %13 : vector<16x1xf32>
    %15 = math.rsqrt %14 : vector<16x1xf32>
    %16 = vector.broadcast %15 : vector<16x1xf32> to vector<16x32xf32>
    %17 = arith.mulf %7, %16 : vector<16x32xf32>
    %c0_5 = arith.constant 0 : index
    %c0_6 = arith.constant 0 : index
    %18 = vector.load %arg2[%c0_5, %c0_6] : memref<1x32xf32, #tpu.memory_space<vmem>>, vector<1x32xf32>
    %19 = vector.broadcast %18 : vector<1x32xf32> to vector<16x32xf32>
    %20 = arith.mulf %17, %19 : vector<16x32xf32>
    %c0_7 = arith.constant 0 : index
    %c0_8 = arith.constant 0 : index
    %21 = vector.load %arg3[%c0_7, %c0_8] : memref<1x32xf32, #tpu.memory_space<vmem>>, vector<1x32xf32>
    %22 = vector.broadcast %21 : vector<1x32xf32> to vector<16x32xf32>
    %23 = arith.addf %20, %22 : vector<16x32xf32>
    %24 = arith.truncf %23 : vector<16x32xf32> to vector<16x32xbf16>
    %c0_9 = arith.constant 0 : index
    %c0_10 = arith.constant 0 : index
    %25 = vector.load %arg4[%c0_9, %c0_10] : memref<16x32xbf16, #tpu.memory_space<vmem>>, vector<16x32xbf16>
    tpu.vector_store %arg4[%c0_9, %c0_10], %24 {strides = array<i32>} : memref<16x32xbf16, #tpu.memory_space<vmem>>, vector<16x32xbf16>,
    return
  }
  func.func @transform_0(%arg0: i32) -> (i32, i32) {
    %c0_i32 = arith.constant 0 : i32
    %c0_i32_0 = arith.constant 0 : i32
    return %arg0, %c0_i32 : i32, i32
  }
  func.func @transform_1(%arg0: i32) -> (i32, i32) {
    %c0_i32 = arith.constant 0 : i32
    %c0_i32_0 = arith.constant 0 : i32
    %c0_i32_1 = arith.constant 0 : i32
    return %c0_i32, %c0_i32_0 : i32, i32
  }
  func.func @transform_2(%arg0: i32) -> (i32, i32) {
    %c0_i32 = arith.constant 0 : i32
    %c0_i32_0 = arith.constant 0 : i32
    %c0_i32_1 = arith.constant 0 : i32
    return %c0_i32, %c0_i32_0 : i32, i32
  }
  func.func @transform_3(%arg0: i32) -> (i32, i32) {
    %c0_i32 = arith.constant 0 : i32
    %c0_i32_0 = arith.constant 0 : i32
    return %arg0, %c0_i32 : i32, i32
  }
}

</mosaic_0001>

<bundles_post_ra>
// kernel: tpu_custom_call.1
= control target key start
LH: loop header
LB: loop body
LE: loop exit
PB: predicated region body
PF: predicated region fallthrough
CT: control target
= control target key end

     0   :  { %8 = vsyncpa [#allocation3], 0  ;;  %s237_s0 = inlined_call_operand.hbm [shape: bf16[16,32], index: 0, kind: input, shape index: {}]   ;;  %s238_s1 = inlined_call_operand.vmem [shape: f32[1,32], index: 1, kind: input, shape index: {}]   ;;  %s239_s2 = inlined_call_operand.vmem [shape: f32[1,32], index: 2, kind: input, shape index: {}]   ;;  %s240_s3 = inlined_call_operand.hbm [shape: bf16[16,32], index: 3, kind: output, shape index: {}]  }
   0x1   :  { %9 = vsyncpa [#allocation4], 0  ;;  %s173_s12 = smov [#allocation2]   ;;  %s125_s16 = scalar_lea.hbm %s237_s0, 128 }
   0x2   :  { %s15_s13 = sshll.u32 %s173_s12, 4  ;;  %p126_p0 = scmp.ne.s32.totalorder %s237_s0, %s125_s16  ;;  %s16_s13 = int_to_ptr.vmem [resolvable:$true] %s15_s13 }
   0x3   :  { %p129_p1 = scmp.lt.u32.totalorder %s125_s16, %s237_s0 }
   0x5   :  { %p131_p2 = pnand %p129_p1, %p126_p0 }
   0x7   :  { %134 = shalt.err (!%p131_p2)
}
   0x8   :  { %s135_s21 = scalar_lea.vmem %s16_s13, 128  ;;  %p140_p4 = scmp.lt.s32.totalorder %s16_s13, %s16_s13 }
   0x9   :  { %p136_p3 = scmp.ne.s32.totalorder %s16_s13, %s135_s21  ;;  %p141_p5 = scmp.lt.s32.totalorder %s135_s21, %s135_s21 }
   0xb   :  { %p142_p6 = por %p141_p5, %p140_p4 }
   0xd   :  { %p143_p7 = pnand %p142_p6, %p136_p3 }
   0xf   :  { %146 = shalt.err (!%p143_p7)
}
  0x10   :  { %s174_s22 = smov 64   ;;  %s175_s23 = smov 4  }
  0x11   :  { %21 = dma.hbm_to_vmem [thread:$0]  %s237_s0, 128, %s16_s13, [#allocation3], %s174_s22, %s174_s22, %s175_s23  }
  0x12   :  { %169 = dma.done.wait [#allocation3], 128  }
  0x13   :  { %170 = vsyncadd [#allocation3], 4294967168  ;;  %v114_v0 = vld [vmem:[#allocation2] sm:$0xff]   ;;  %vm33_vm0 = vcmask 261120   ;;  %vm87_vm1 = vcmask 257024   ;;  %s176_s29 = smov [#allocation5]  }
  0x14   :  { %v115_v1 = vunpack.c.l.bf16 %v114_v0  ;;  %v116_v2 = vunpack.c.h.bf16 %v114_v0  ;;  %v107_v22 = vld [vmem:[%s238_s1] ss:$0 sm:$0xff]  ;;  %s95_s30 = sshll.u32 %s176_s29, 4  ;;  %s96_s30 = int_to_ptr.vmem [resolvable:$true] %s95_s30 }
  0x15   :  { %v108_v24 = vld [vmem:[%s239_s2] ss:$0 sm:$0xff]  ;;  %s147_s1 = scalar_lea.vmem %s96_s30, 128  ;;  %p152_p9 = scmp.lt.s32.totalorder %s96_s30, %s96_s30 }
  0x16   :  { %v34_v3 = vsel %vm33_vm0, %v115_v1, 0.0  ;;  %v37_v4 = vsel %vm33_vm0, %v116_v2, 0.0  ;;  %p148_p8 = scmp.ne.s32.totalorder %s96_s30, %s147_s1  ;;  %p153_p10 = scmp.lt.s32.totalorder %s147_s1, %s147_s1 }
  0x17   :  { %35 = vadd.xlane.f32.xlu0 %v34_v3 }
  0x18   :  { %p154_p11 = por %p153_p10, %p152_p9 }
  0x1a   :  { %p155_p12 = pnand %p154_p11, %p148_p8 }
  0x1b   :  { %38 = vadd.xlane.f32.xlu0 %v37_v4 }
  0xa4   :  { %v36_v5 = vpop.xlane.xlu0 %35 }
  0xa5   :  { %v41_v6 = vmul.f32 0.03125, %v36_v5 }
  0xa7   :  { %v43_v7 = vsub.f32 %v115_v1, %v41_v6 }
  0xa8   :  { %v39_v8 = vpop.xlane.xlu0 %38 }
  0xa9   :  { %v42_v9 = vmul.f32 0.03125, %v39_v8  ;;  %v45_v10 = vmul.f32 %v43_v7, %v43_v7 }
  0xab   :  { %v44_v11 = vsub.f32 %v116_v2, %v42_v9  ;;  %v47_v12 = vsel %vm33_vm0, %v45_v10, 0.0 }
  0xac   :  { %48 = vadd.xlane.f32.xlu1 %v47_v12 }
  0xad   :  { %v46_v13 = vmul.f32 %v44_v11, %v44_v11 }
  0xaf   :  { %v50_v14 = vsel %vm33_vm0, %v46_v13, 0.0 }
  0xb0   :  { %51 = vadd.xlane.f32.xlu1 %v50_v14 }
 0x139   :  { %v49_v15 = vpop.xlane.xlu1 %48 }
 0x13a   :  { %v53_v16 = vmul.f32 0.03125, %v49_v15 }
 0x13c   :  { %v55_v17 = vadd.f32 1e-12, %v53_v16 }
 0x13d   :  { %v52_v18 = vpop.xlane.xlu1 %51 }
 0x13e   :  { %121 = vrsqrt.f32 %v55_v17  ;;  %v54_v19 = vmul.f32 0.03125, %v52_v18 }
 0x140   :  { %v56_v20 = vadd.f32 1e-12, %v54_v19 }
 0x142   :  { %123 = vrsqrt.f32 %v56_v20 }
 0x148   :  { %v122_v21 = vpop.eup %121 }
 0x149   :  { %v59_v23 = vmul.f32 %v122_v21, %v43_v7 }
 0x14b   :  { %v68_v25 = vmul.f32 %v107_v22, %v59_v23 }
 0x14c   :  { %v124_v26 = vpop.eup %123 }
 0x14d   :  { %v60_v27 = vmul.f32 %v124_v26, %v44_v11  ;;  %v77_v28 = vadd.f32 %v108_v24, %v68_v25 }
 0x14f   :  { %v69_v29 = vmul.f32 %v107_v22, %v60_v27  ;;  %v111_v30 = vpack.c.bf16 %v77_v28, %v77_v28 }
 0x151   :  { %v78_v31 = vadd.f32 %v108_v24, %v69_v29  ;;  %88 = vst.msk [vmem:[#allocation5] sm:$0xf] %vm87_vm1, %v111_v30 }
 0x153   :  { %v112_v32 = vpack.c.bf16 %v78_v31, %v78_v31 }
 0x155   :  { %89 = vst.msk [vmem:[#allocation5 + $0x4] sm:$0xf] %vm87_vm1, %v112_v32 }
 0x156   :  { %158 = shalt.err (!%p155_p12)
}
 0x157   :  { %s159_s5 = scalar_lea.hbm %s240_s3, 128 }
 0x158   :  { %p160_p13 = scmp.ne.s32.totalorder %s240_s3, %s159_s5  ;;  %p163_p0 = scmp.lt.u32.totalorder %s159_s5, %s240_s3 }
 0x15a   :  { %p165_p1 = pnand %p163_p0, %p160_p13 }
 0x15c   :  { %168 = shalt.err (!%p165_p1)
}
 0x15d   :  { %101 = dma.vmem_to_hbm [thread:$0]  %s96_s30, 128, %s240_s3, [#allocation4], %s174_s22, %s174_s22, %s175_s23  }
 0x15e   :  { %171 = dma.done.wait [#allocation4], 128  }
 0x15f   :  { %172 = vsyncadd [#allocation4], 4294967168 }
 0x160   :  { %105 = vsyncpa [#allocation3], 1 }
 0x161   :  { %106 = vsyncpa [#allocation4], 1 }

</bundles_post_ra>
